<compile_context>
chip_gen: v7x
topology: tpu7x:2x2x1
jax: 0.10.0
libtpu: 0.0.40
codegen_flags: <defaults>
</compile_context>

<pallas_src>
import functools
import math

import jax
import jax.numpy as jnp
from jax import lax
from jax.experimental import pallas as pl
from jax.experimental.pallas import tpu as pltpu


def _modulated_conv2d_kernel(style_ref, mod_wT_ref, mod_b_ref, w_flat_ref,
                             x_cols_ref, out_ref, *, scale, mod_scale):
    b = pl.program_id(0)

    # --- EqualLinear modulation, already tiled per conv tap ------------------
    # s_full[j] = s[j % in_ch] for column j of the flattened (tap, in_ch) axis.
    style_b = style_ref[pl.ds(b, 1), :]                         # (1, z_dim)
    s_full = jnp.dot(style_b, mod_wT_ref[...],
                     preferred_element_type=jnp.float32,
                     precision=lax.Precision.HIGHEST) * mod_scale
    s_full = s_full + mod_b_ref[...]                            # (1, kk*in_ch)

    # --- modulate + demodulate the flattened weight --------------------------
    w = w_flat_ref[...] * s_full                                # (out_ch, kk*in_ch)
    sqsum = jnp.sum(w * w, axis=1, keepdims=True)               # (out_ch, 1)
    demod = lax.rsqrt(scale * scale * sqsum + 1e-8)             # rsqrt -> EUP
    w = w * (scale * demod)                                     # fold scale*demod

    # --- single MXU matmul: (out_ch, kk*in_ch) @ (kk*in_ch, H*W) --------------
    out_ref[0] = jnp.dot(w, x_cols_ref[0],
                         preferred_element_type=jnp.float32,
                         precision=lax.Precision.HIGHEST).astype(out_ref.dtype)


def modulated_conv2d(x, style, weight, mod_weight, mod_bias, *, kernel_size):
    """Forward of ModulatedConv2d (upsample=False, downsample=False).

    x:          (B, in_ch, H, W)
    style:      (B, z_dim)
    weight:     (1, out_ch, in_ch, k, k)   ModulatedConv2d.weight
    mod_weight: (in_ch, z_dim)             EqualLinear.weight (lr_mul = 1)
    mod_bias:   (in_ch,)                   EqualLinear.bias   (bias_init = 1)
    """
    B, in_ch, H, W = x.shape
    _, out_ch, _, k, _ = weight.shape
    assert k == kernel_size
    z_dim = style.shape[1]
    kk = k * k
    hw = H * W
    pad = k // 2

    scale = 1.0 / math.sqrt(in_ch * k * k)
    mod_scale = 1.0 / math.sqrt(z_dim)     # EqualLinear scale, lr_mul = 1

    # im2col in the wrapper: (B, kk*in_ch, H*W), lane-dense last dim.
    # Row index = tap * in_ch + channel, tap = dy * k + dx.
    x_pad = jnp.pad(x, ((0, 0), (0, 0), (pad, pad), (pad, pad)))
    cols = jnp.stack(
        [x_pad[:, :, dy:dy + H, dx:dx + W]
         for dy in range(k) for dx in range(k)],
        axis=1)                                                 # (B, kk, in_ch, H, W)
    x_cols = cols.reshape(B, kk * in_ch, hw).astype(jnp.float32)

    # Flattened weight with the same (tap, in_ch) column order.
    w_flat = jnp.transpose(weight[0], (0, 2, 3, 1)).reshape(out_ch, kk * in_ch)
    w_flat = w_flat.astype(jnp.float32)

    # Modulation weights pre-tiled per tap so one tiny dot yields the full
    # per-column modulation vector inside the kernel.
    mod_wT = jnp.transpose(mod_weight).astype(jnp.float32)      # (z_dim, in_ch)
    mod_wT_tiled = jnp.tile(mod_wT, (1, kk))                    # (z_dim, kk*in_ch)
    mod_b_tiled = jnp.tile(mod_bias.reshape(1, in_ch).astype(jnp.float32),
                           (1, kk))                             # (1, kk*in_ch)

    kernel = functools.partial(_modulated_conv2d_kernel,
                               scale=scale, mod_scale=mod_scale)

    itemsize = 4
    cost = pl.CostEstimate(
        flops=int(2 * B * out_ch * (kk * in_ch) * hw
                  + 2 * B * z_dim * (kk * in_ch)),
        transcendentals=int(B * out_ch),
        bytes_accessed=int((x_cols.size + B * out_ch * hw + w_flat.size
                            + style.size + mod_wT_tiled.size
                            + mod_b_tiled.size) * itemsize),
    )

    # Small constants: whole-array, resident in VMEM, not pipelined.
    vmem_whole = pl.BlockSpec(memory_space=pltpu.MemorySpace.VMEM)

    out_flat = pl.pallas_call(
        kernel,
        out_shape=jax.ShapeDtypeStruct((B, out_ch, hw), jnp.float32),
        grid_spec=pltpu.PrefetchScalarGridSpec(
            num_scalar_prefetch=0,
            grid=(B,),
            in_specs=[
                vmem_whole,                                           # style
                vmem_whole,                                           # mod_wT_tiled
                vmem_whole,                                           # mod_b_tiled
                vmem_whole,                                           # w_flat
                pl.BlockSpec((1, kk * in_ch, hw), lambda b: (b, 0, 0)),
            ],
            out_specs=pl.BlockSpec((1, out_ch, hw), lambda b: (b, 0, 0)),
        ),
        compiler_params=pltpu.CompilerParams(
            dimension_semantics=("parallel",),
        ),
        cost_estimate=cost,
    )(style.astype(jnp.float32), mod_wT_tiled, mod_b_tiled, w_flat, x_cols)

    return out_flat.reshape(B, out_ch, H, W)


def ref_modulated_conv2d(x, style, weight, mod_weight, mod_bias):
    """Pure-JAX reference mirroring the PyTorch forward (default path)."""
    B, in_ch, H, W = x.shape
    _, out_ch, _, k, _ = weight.shape
    z_dim = style.shape[1]
    scale = 1.0 / math.sqrt(in_ch * k * k)
    mod_scale = 1.0 / math.sqrt(z_dim)

    s = jnp.dot(style, (mod_weight * mod_scale).T,
                precision=lax.Precision.HIGHEST) + mod_bias       # (B, in_ch)
    w = scale * weight * s[:, None, :, None, None]                # (B,O,I,k,k)
    demod = lax.rsqrt(jnp.sum(w * w, axis=(2, 3, 4)) + 1e-8)      # (B,O)
    w = w * demod[:, :, None, None, None]

    pad = k // 2
    outs = []
    for b in range(B):
        outs.append(lax.conv_general_dilated(
            x[b:b + 1], w[b],
            window_strides=(1, 1),
            padding=[(pad, pad), (pad, pad)],
            dimension_numbers=("NCHW", "OIHW", "NCHW"),
            precision=lax.Precision.HIGHEST))
    return jnp.concatenate(outs, axis=0)


if __name__ == "__main__":
    key = jax.random.PRNGKey(0)
    k1, k2, k3, k4 = jax.random.split(key, 4)

    batch, in_ch, out_ch = 2, 4, 4
    H = W = 16
    kernel_size = 3
    z_dim = 8

    x = jax.random.normal(k1, (batch, in_ch, H, W), dtype=jnp.float32)
    style = jax.random.normal(k2, (batch, z_dim), dtype=jnp.float32)
    weight = jax.random.normal(
        k3, (1, out_ch, in_ch, kernel_size, kernel_size), dtype=jnp.float32)
    mod_weight = jax.random.normal(k4, (in_ch, z_dim), dtype=jnp.float32)
    mod_bias = jnp.ones((in_ch,), dtype=jnp.float32)   # bias_init = 1

    out = modulated_conv2d(x, style, weight, mod_weight, mod_bias,
                           kernel_size=kernel_size)
    out = jax.block_until_ready(out)

    ref = ref_modulated_conv2d(x, style, weight, mod_weight, mod_bias)
    assert out.shape == (batch, out_ch, H, W), out.shape
    max_err = float(jnp.max(jnp.abs(out - ref)))
    assert jnp.allclose(out, ref, atol=1e-4, rtol=1e-3), f"max abs err {max_err}"

    print("KERNEL_OK")
</pallas_src>

<mosaic_0001>
module attributes {stable_mosaic.version = 11 : i64} {
  func.func @_modulated_conv2d_kernel(%arg0: i32, %arg1: memref<2x8xf32, #tpu.memory_space<vmem>>, %arg2: memref<8x36xf32, #tpu.memory_space<vmem>>, %arg3: memref<1x36xf32, #tpu.memory_space<vmem>>, %arg4: memref<4x36xf32, #tpu.memory_space<vmem>>, %arg5: memref<1x36x256xf32, #tpu.memory_space<vmem>>, %arg6: memref<1x4x256xf32, #tpu.memory_space<vmem>>) attributes {dimension_semantics = [#tpu.dimension_semantics<parallel>], iteration_bounds = array<i64: 2>, scalar_prefetch = 0 : i64, scratch_operands = 0 : i64, tpu.core_type = #tpu.core_type<tc>, window_params = [{pipeline_mode = #tpu.pipeline_mode<synchronous>, transform_indices = @transform_0, window_bounds = array<i64: 2, 8>}, {pipeline_mode = #tpu.pipeline_mode<synchronous>, transform_indices = @transform_1, window_bounds = array<i64: 8, 36>}, {pipeline_mode = #tpu.pipeline_mode<synchronous>, transform_indices = @transform_2, window_bounds = array<i64: 1, 36>}, {pipeline_mode = #tpu.pipeline_mode<synchronous>, transform_indices = @transform_3, window_bounds = array<i64: 4, 36>}, {transform_indices = @transform_4, window_bounds = array<i64: 1, 36, 256>}, {transform_indices = @transform_5, window_bounds = array<i64: 1, 4, 256>}]} {
    %0 = arith.index_cast %arg0 : i32 to index
    %c0 = arith.constant 0 : index
    %1 = vector.load %arg1[%0, %c0] : memref<2x8xf32, #tpu.memory_space<vmem>>, vector<1x8xf32>
    %c0_0 = arith.constant 0 : index
    %c0_1 = arith.constant 0 : index
    %2 = vector.load %arg2[%c0_0, %c0_1] : memref<8x36xf32, #tpu.memory_space<vmem>>, vector<8x36xf32>
    %cst = arith.constant dense<0.000000e+00> : vector<1x36xf32>
    %3 = tpu.matmul %1, %2, %cst {dimension_numbers = #tpu.dot_dimension_numbers<[1], [0], [0], [1], [0, 0, 1, 1], [], []>, precision = #tpu.contract_precision<fp32>} : vector<1x8xf32>, vector<8x36xf32>, vector<1x36xf32> -> vector<1x36xf32>
    %cst_2 = arith.constant 0.353553385 : f32
    %4 = vector.broadcast %cst_2 : f32 to vector<1x36xf32>
    %5 = arith.mulf %3, %4 : vector<1x36xf32>
    %c0_3 = arith.constant 0 : index
    %c0_4 = arith.constant 0 : index
    %6 = vector.load %arg3[%c0_3, %c0_4] : memref<1x36xf32, #tpu.memory_space<vmem>>, vector<1x36xf32>
    %7 = arith.addf %5, %6 : vector<1x36xf32>
    %c0_5 = arith.constant 0 : index
    %c0_6 = arith.constant 0 : index
    %8 = vector.load %arg4[%c0_5, %c0_6] : memref<4x36xf32, #tpu.memory_space<vmem>>, vector<4x36xf32>
    %9 = vector.broadcast %7 : vector<1x36xf32> to vector<4x36xf32>
    %10 = arith.mulf %8, %9 : vector<4x36xf32>
    %11 = arith.mulf %10, %10 : vector<4x36xf32>
    %cst_7 = arith.constant dense<0.000000e+00> : vector<4xf32>
    %12 = vector.multi_reduction <add>, %11, %cst_7 [1] : vector<4x36xf32> to vector<4xf32>
    %13 = vector.shape_cast %12 : vector<4xf32> to vector<4x1xf32>
    %cst_8 = arith.constant 0.027777778 : f32
    %14 = vector.broadcast %cst_8 : f32 to vector<4x1xf32>
    %15 = arith.mulf %14, %13 : vector<4x1xf32>
    %cst_9 = arith.constant 9.99999993E-9 : f32
    %16 = vector.broadcast %cst_9 : f32 to vector<4x1xf32>
    %17 = arith.addf %15, %16 : vector<4x1xf32>
    %18 = math.rsqrt %17 : vector<4x1xf32>
    %cst_10 = arith.constant 0.166666672 : f32
    %19 = vector.broadcast %cst_10 : f32 to vector<4x1xf32>
    %20 = arith.mulf %19, %18 : vector<4x1xf32>
    %21 = vector.broadcast %20 : vector<4x1xf32> to vector<4x36xf32>
    %22 = arith.mulf %10, %21 : vector<4x36xf32>
    %c0_11 = arith.constant 0 : index
    %c0_12 = arith.constant 0 : index
    %c0_13 = arith.constant 0 : index
    %23 = vector.load %arg5[%c0_11, %c0_12, %c0_13] : memref<1x36x256xf32, #tpu.memory_space<vmem>>, vector<1x36x256xf32>
    %24 = vector.shape_cast %23 : vector<1x36x256xf32> to vector<36x256xf32>
    %cst_14 = arith.constant dense<0.000000e+00> : vector<4x256xf32>
    %25 = tpu.matmul %22, %24, %cst_14 {dimension_numbers = #tpu.dot_dimension_numbers<[1], [0], [0], [1], [0, 0, 1, 1], [], []>, precision = #tpu.contract_precision<fp32>} : vector<4x36xf32>, vector<36x256xf32>, vector<4x256xf32> -> vector<4x256xf32>
    %c0_15 = arith.constant 0 : index
    %c0_16 = arith.constant 0 : index
    %c0_17 = arith.constant 0 : index
    %26 = vector.load %arg6[%c0_15, %c0_16, %c0_17] : memref<1x4x256xf32, #tpu.memory_space<vmem>>, vector<1x4x256xf32>
    %27 = vector.shape_cast %26 : vector<1x4x256xf32> to vector<4x256xf32>
    %28 = vector.shape_cast %25 : vector<4x256xf32> to vector<1x4x256xf32>
    tpu.vector_store %arg6[%c0_15, %c0_16, %c0_17], %28 {strides = array<i32>} : memref<1x4x256xf32, #tpu.memory_space<vmem>>, vector<1x4x256xf32>,
    return
  }
  func.func @transform_0(%arg0: i32) -> (i32, i32) {
    %c0_i32 = arith.constant 0 : i32
    %c0_i32_0 = arith.constant 0 : i32
    %c0_i32_1 = arith.constant 0 : i32
    return %c0_i32, %c0_i32_0 : i32, i32
  }
  func.func @transform_1(%arg0: i32) -> (i32, i32) {
    %c0_i32 = arith.constant 0 : i32
    %c0_i32_0 = arith.constant 0 : i32
    %c0_i32_1 = arith.constant 0 : i32
    return %c0_i32, %c0_i32_0 : i32, i32
  }
  func.func @transform_2(%arg0: i32) -> (i32, i32) {
    %c0_i32 = arith.constant 0 : i32
    %c0_i32_0 = arith.constant 0 : i32
    %c0_i32_1 = arith.constant 0 : i32
    return %c0_i32, %c0_i32_0 : i32, i32
  }
  func.func @transform_3(%arg0: i32) -> (i32, i32) {
    %c0_i32 = arith.constant 0 : i32
    %c0_i32_0 = arith.constant 0 : i32
    %c0_i32_1 = arith.constant 0 : i32
    return %c0_i32, %c0_i32_0 : i32, i32
  }
  func.func @transform_4(%arg0: i32) -> (i32, i32, i32) {
    %c0_i32 = arith.constant 0 : i32
    %c0_i32_0 = arith.constant 0 : i32
    %c0_i32_1 = arith.constant 0 : i32
    return %arg0, %c0_i32, %c0_i32_0 : i32, i32, i32
  }
  func.func @transform_5(%arg0: i32) -> (i32, i32, i32) {
    %c0_i32 = arith.constant 0 : i32
    %c0_i32_0 = arith.constant 0 : i32
    %c0_i32_1 = arith.constant 0 : i32
    return %arg0, %c0_i32, %c0_i32_0 : i32, i32, i32
  }
}

</mosaic_0001>

<bundles_post_ra>
// kernel: tpu_custom_call.1
= control target key start
LH: loop header
LB: loop body
LE: loop exit
PB: predicated region body
PF: predicated region fallthrough
CT: control target
= control target key end

     0   :  { %10 = vsyncpa [#allocation3], 0  ;;  %s1849_s0 = inlined_call_operand.vmem [shape: f32[2,8], index: 0, kind: input, shape index: {}]   ;;  %s1850_s1 = inlined_call_operand.vmem [shape: f32[8,36], index: 1, kind: input, shape index: {}]   ;;  %s1851_s2 = inlined_call_operand.vmem [shape: f32[1,36], index: 2, kind: input, shape index: {}]   ;;  %s1852_s3 = inlined_call_operand.vmem [shape: f32[4,36], index: 3, kind: input, shape index: {}]   ;;  %s1853_s4 = inlined_call_operand.vmem [shape: f32[2,36,256], index: 4, kind: input, shape index: {}]   ;;  %s1854_s5 = inlined_call_operand.hbm [shape: f32[2,4,256], index: 5, kind: output, shape index: {}]  }
   0x1   :  { %12 = vsyncpa [#allocation3 + $0x1], 0  ;;  %s1628_s18 = smov 0   ;;  %s1630_s19 = smov 0  }
   0x2   :  { %s1632_s20 = smov 0   ;;  %s1634_s21 = smov 0  }
   0x3 LB: > { %s1649_s22 = sadd.s32 4294967295, %s1593_s21   ;;  %s1365_s23 = sadd.s32 4294967294, %s1593_s21   ;;  %s1593_s21 = sphi %s1634_s21, %s1860_s21   ;;  %s1589_s20 = sphi %s1632_s20, %s1859_s20   ;;  %s1585_s19 = sphi %s1630_s19, %s1858_s19   ;;  %s1581_s18 = sphi %s1628_s18, %s1857_s18  }
   0x4   : > { %s1653_s24 = sadd.s32 1, %s1593_s21   ;;  %s135_s25 = sadd.s32 1, %s1589_s20 }
   0x5   : > { %s132_s26 = ssub.s32 %s1593_s21, %s1653_s24  ;;  %p145_p0 = scmp.ne.s32.totalorder %s1589_s20, %s1585_s19 }
   0x6   : > { %p133_p1 = scmp.eq.s32.totalorder %s132_s26, 0  ;;  %p146_p2 = scmp.eq.s32.totalorder %s1649_s22, 1 }
   0x7   : > { %p151_p3 = scmp.ne.s32.totalorder %s1585_s19, %s1581_s18  ;;  %p152_p4 = scmp.eq.s32.totalorder %s1365_s23, 1 }
   0x8   : > { %s1664_s27 = scalar_select %p133_p1, %s1589_s20, %s135_s25  }
   0x9   : > { %p1666_p5 = por %p146_p2, %p145_p0  ;;  %p1670_p6 = por %p152_p4, %p151_p3 }
   0xa   : > { %p1368_p7 = scmp.ge.s32.totalorder %s1593_s21, 1  ;;  %p190_p8 = scmp.lt.s32.totalorder %s1593_s21, 3 }
   0xc   : > { %p191_p9 = pnand %p1368_p7, %p190_p8 }
   0xd   : > { %v225_v0 = vld [vmem:[%s1850_s1] sm:$0xff] (!%p191_p9)  ;;  %s223_s9 = scalar_lea.vmem (!%p191_p9), %s1849_s0, %s1649_s22  ;;  %vm226_vm0 = vcmask (!%p191_p9), 64512   ;;  %v1595_v1 = vmov (!%p191_p9), 0.0   ;;  %vm1596_vm1 = vmmov (!%p191_p9), 0   ;;  %v680_v14 = vlaneseq (!%p191_p9)  ;;  %p218_p10 = scmp.lt.s32.totalorder (!%p191_p9), %s1649_s22, 1 }
   0xe   : > { %194 = sbr.rel (%p191_p9) target bundleno = 716 (0x2cc), region = 40  ;;  %1389 = vmatprep.subr.mxu0 (!%p191_p9), %v1595_v1  ;;  %v231_v2 = vand.u32 (!%p191_p9), 4294901760, %v225_v0  ;;  %1391 = vmatprep.mubr.msk.f32.mxu0 (!%p191_p9), %vm1596_vm1, %v1595_v1  ;;  %v224_v3 = vld [vmem:[%s223_s9] sm:$0x1] (!%p191_p9)  ;;  %vm686_vm2 = vcmask (!%p191_p9), 289792   ;;  %vm709_vm3 = vcmask (!%p191_p9), 1043456  }
   0xf   : > { %v228_v4 = vsel (!%p191_p9), %vm226_vm0, %v224_v3, 0  ;;  %1008 = vmatprep.mubr.f32.mxu1 (!%p191_p9), %v1595_v1  ;;  %v681_v15 = vshrl.u32 (!%p191_p9), %v680_v14, 7  ;;  %v677_v17 = vld [vmem:[%s1851_s2] sm:$0x1] (!%p191_p9)  ;;  %vm705_vm4 = vcmask (!%p191_p9), 293888   ;;  %s215_s25 = sand.u32 (!%p191_p9), 1, %s1585_s19  }
  0x10   : > { %1390 = vmatpush3.msra.mxu0 (!%p191_p9), %v231_v2  ;;  %v308_v5 = vsub.f32 (!%p191_p9), %v225_v0, %v231_v2  ;;  %v296_v6 = vand.u32 (!%p191_p9), 4294901760, %v228_v4  ;;  %v679_v22 = vld [vmem:[%s1852_s3] sm:$0xf] (!%p191_p9)  ;;  %s1369_s26 = sshll.u32 (!%p191_p9), %s215_s25, 3  ;;  %s1376_s30 = sshll.u32 (!%p191_p9), %s1649_s22, 7 }
  0x11   : > { %1394 = vmatprep.subr.mxu0 (!%p191_p9), %v1595_v1  ;;  %v682_v19 = vsub.s32 (!%p191_p9), 0, %v681_v15  ;;  %s217_s6 = scalar_lea.vmem (!%p191_p9), [#allocation2], %s1369_s26  ;;  %s1807_s10 = scalar_lea.hbm (!%p191_p9), %s1854_s5, %s1376_s30 }
  0x12   : > { %v297_v7 = vsub.f32 (!%p191_p9), %v228_v4, %v296_v6  ;;  %v309_v8 = vand.u32 (!%p191_p9), 4294901760, %v308_v5  ;;  %s1305_s7 = sshll.u32 (!%p191_p9), %s217_s6, 4  ;;  %s1291_s11 = scalar_lea.sflag (!%p191_p9), [#allocation3], %s215_s25  ;;  %s1809_s7 = int_to_ptr.vmem [resolvable:$true] %s1305_s7 }
  0x13   : > { %s1531_s12 = scalar_lea.vmem (!%p191_p9), %s1809_s7, 128 }
  0x14   : > { %v298_v9 = vand.u32 (!%p191_p9), 4294901760, %v297_v7  ;;  %v310_v10 = vsub.f32 (!%p191_p9), %v308_v5, %v309_v8  ;;  %p1532_p11 = scmp.ne.s32.totalorder (!%p191_p9), %s1809_s7, %s1531_s12 }
  0x15   : > { %s219_s14 = scalar_select %p218_p10, %s1649_s22, 1 }
  0x16   : > { %v299_v11 = vsub.f32 %v297_v7, %v298_v9  ;;  %v311_v12 = vand.u32 4294901760, %v310_v10  ;;  %p1533_p12 = pnand %p1532_p11, %p1666_p5  ;;  %s1597_s22 = smov [#allocation2]  }
  0x17   : > { %s1487_s15 = smul.u32 80, %s219_s14  ;;  %s1535_s13 = sshll.u32 %s1597_s22, 4  ;;  %s1536_s13 = int_to_ptr.vmem [resolvable:$false] %s1535_s13 }
  0x18   : > { %v300_v13 = vand.u32 4294901760, %v299_v11  ;;  %p1534_p13 = pneg %p1533_p12  ;;  %s1537_s14 = scalar_lea.vmem %s1536_s13, 256 }
  0x19   : > { %s1718_s23 = scalar_lea.vmem %s1853_s4, %s1487_s15  ;;  %p1538_p0 = scmp.lt.s32.totalorder %s1809_s7, %s1536_s13 }
  0x1a   : > { %1392 = vmatmul.mubr.f32.vlgmr.msra.gmra.mrb[0].mxu0 %v300_v13  ;;  %v696_v27 = vld [vmem:[%s1718_s23 + $0x8] sm:$0xff]  ;;  %v698_v28 = vld [vmem:[%s1718_s23 + $0x18] sm:$0xff]  ;;  %v695_v31 = vld [vmem:[%s1718_s23] sm:$0xff]  ;;  %p1539_p1 = scmp.lt.s32.totalorder %s1537_s14, %s1531_s12 }
  0x1b   : > { %1395 = vmatpush3.msra.mxu0 %v311_v12  ;;  %1396 = vmatprep.mubr.msk.f32.mxu0 %vm1596_vm1, %v1595_v1  ;;  %v716_v29 = vand.u32 4294901760, %v696_v27  ;;  %v720_v30 = vand.u32 4294901760, %v698_v28  ;;  %v697_v32 = vld [vmem:[%s1718_s23 + $0x10] sm:$0xff]  ;;  %v718_v33 = vand.u32 4294901760, %v695_v31  ;;  %v700_v39 = vld [vmem:[%s1718_s23 + $0x28] sm:$0xff]  ;;  %v702_v40 = vld [vmem:[%s1718_s23 + $0x38] sm:$0xff] }
  0x1c   : > { %1399 = vmatprep.subr.mxu0 %v1595_v1  ;;  %v722_v34 = vand.u32 4294901760, %v697_v32  ;;  %v724_v42 = vand.u32 4294901760, %v700_v39  ;;  %v728_v43 = vand.u32 4294901760, %v702_v40  ;;  %v699_v44 = vld [vmem:[%s1718_s23 + $0x20] sm:$0xff]  ;;  %v701_v45 = vld [vmem:[%s1718_s23 + $0x30] sm:$0xff]  ;;  %p1540_p2 = por %p1539_p1, %p1538_p0 }
  0x1d   : > { %v1724_v35 = vsub.f32 %v696_v27, %v716_v29  ;;  %v1726_v36 = vsub.f32 %v698_v28, %v720_v30  ;;  %v1728_v37 = vsub.f32 %v695_v31, %v718_v33  ;;  %v726_v47 = vand.u32 4294901760, %v699_v44  ;;  %v704_v54 = vld [vmem:[%s1718_s23 + $0x48] sm:$0xf]  ;;  %v703_v57 = vld [vmem:[%s1718_s23 + $0x40] sm:$0xf] }
  0x1e   : > { %v1730_v38 = vsub.f32 %v697_v32, %v722_v34  ;;  %v730_v48 = vand.u32 4294901760, %v701_v45  ;;  %v1740_v49 = vsub.f32 %v700_v39, %v724_v42  ;;  %v839_v50 = vsub.f32 %v702_v40, %v728_v43  ;;  %p1541_p3 = pnand %p1540_p2, %p1534_p13 }
  0x1f   : > { %v1435_v41 = vpack.c.bf16 %v1726_v36, %v1724_v35  ;;  %v833_v51 = vsub.f32 %v699_v44, %v726_v47  ;;  %v714_v56 = vsel %vm709_vm3, %v704_v54, 0  ;;  %v1745_v58 = vpack.c.bf16 %v720_v30, %v716_v29 }
  0x20   : > { %v1437_v46 = vpack.c.bf16 %v1730_v38, %v1728_v37  ;;  %v845_v52 = vsub.f32 %v701_v45, %v730_v48  ;;  %v1439_v53 = vpack.c.bf16 %v839_v50, %v1740_v49  ;;  %v1747_v59 = vpack.c.bf16 %v722_v34, %v718_v33 }
  0x21   : > { %1436 = vmatprep.subr.bf16.mxu1 %v1435_v41  ;;  %v1749_v60 = vand.u32 4294901760, %v714_v56  ;;  %v711_v61 = vsel %vm709_vm3, %v703_v57, 0  ;;  %v1751_v62 = vpack.c.bf16 %v728_v43, %v724_v42  ;;  %v810_v3 = vand.u32 4294901760, %v1728_v37 }
  0x22   : > { %1397 = vmatmul.mubr.f32.vlgmr.msra.gmra.mrb[0].mxu0 %v296_v6  ;;  %1438 = vmatpush1.bf16.msra.mxu1 %v1437_v46  ;;  %v1441_v55 = vpack.c.bf16 %v845_v52, %v833_v51  ;;  %v1754_v63 = vand.u32 4294901760, %v711_v61  ;;  %v822_v4 = vand.u32 4294901760, %v1730_v38  ;;  %v828_v14 = vand.u32 4294901760, %v1740_v49 }
  0x23   : > { %1400 = vmatpush3.msra.mxu0 %v308_v5  ;;  %1401 = vmatprep.mubr.msk.f32.mxu0 %vm1596_vm1, %v1595_v1  ;;  %v1758_v0 = vsub.f32 %v714_v56, %v1749_v60  ;;  %v811_v10 = vsub.f32 %v1728_v37, %v810_v3  ;;  %v840_v15 = vand.u32 4294901760, %v839_v50 }
  0x24   : > { %1404 = vmatprep.subr.mxu0 %v1595_v1  ;;  %1440 = vmatprep.subr.bf16.mxu1 %v1439_v53  ;;  %v1765_v5 = vsub.f32 %v711_v61, %v1754_v63  ;;  %v823_v11 = vsub.f32 %v1730_v38, %v822_v4  ;;  %v1453_v34 = vpack.c.bf16 %v822_v4, %v810_v3 }
  0x26   : > { %1442 = vmatpush1.bf16.msra.mxu1 %v1441_v55 }
  0x27   : > { %950 = vmatprep.subr.mxu1 %v1758_v0 }
  0x2a   : > { %1402 = vmatmul.mubr.f32.vlgmr.msra.gmra.mrb[0].mxu0 %v297_v7  ;;  %v816_v7 = vand.u32 4294901760, %v1726_v36  ;;  %953 = vmatpush1.msra.mxu1 %v1765_v5 }
  0x2b   : > { %1405 = vmatpush3.msra.mxu0 %v231_v2  ;;  %1406 = vmatprep.mubr.msk.f32.mxu0 %vm1596_vm1, %v1595_v1 }
  0x2c   : > { %1409 = vmatprep.subr.mxu0 %v1595_v1  ;;  %1444 = vmatprep.subr.bf16.mxu1 %v1745_v58 }
  0x32   : > { %1407 = vmatmul.mubr.f32.vlgmr.msra.gmra.mrb[0].mxu0 %v298_v9  ;;  %v817_v9 = vsub.f32 %v1726_v36, %v816_v7 }
  0x33   : > { %1410 = vmatpush3.msra.mxu0 %v309_v8  ;;  %1411 = vmatprep.mubr.msk.f32.mxu0 %vm1596_vm1, %v1595_v1 }
  0x34   : > { %1414 = vmatprep.subr.mxu0 %v1595_v1  ;;  %v818_v13 = vand.u32 4294901760, %v817_v9 }
  0x3a   : > { %1412 = vmatmul.mubr.f32.vlgmr.msra.gmra.mrb[0].mxu0 %v296_v6 }
  0x3b   : > { %1415 = vmatpush3.msra.mxu0 %v231_v2  ;;  %1416 = vmatprep.mubr.msk.f32.mxu0 %vm1596_vm1, %v1595_v1  ;;  %v1760_v2 = vpack.c.bf16 %v730_v48, %v726_v47  ;;  %v852_v47 = vand.u32 4294901760, %v1758_v0 }
  0x3c   : > { %1420 = vmatprep.subr.bf16.mxu0 %v1745_v58 }
  0x42   : > { %1417 = vmatmul.mubr.f32.vlgmr.msra.gmra.mrb[0].mxu0 %v296_v6  ;;  %v804_v6 = vand.u32 4294901760, %v1724_v35 }
  0x43   : > { %790 = vmatprep.mubr.f32.mxu0 %v1595_v1  ;;  %1422 = vmatpush1.bf16.msra.mxu0 %v1747_v59 }
  0x44   : > { %1424 = vmatprep.subr.bf16.mxu0 %v1751_v62  ;;  %v805_v8 = vsub.f32 %v1724_v35, %v804_v6  ;;  %v1451_v32 = vpack.c.bf16 %v816_v7, %v804_v6  ;;  %v1455_v35 = vpack.c.bf16 %v840_v15, %v828_v14 }
  0x46   : > { %v806_v12 = vand.u32 4294901760, %v805_v8 }
  0x47   : > { %1426 = vmatpush1.bf16.msra.mxu0 %v1760_v2 }
  0x48   : > { %733 = vmatprep.subr.mxu0 %v1749_v60 }
  0x4b   : > { %735 = vmatpush1.msra.mxu0 %v1754_v63 }
 0x115   : > { %v672_v16 = vpop.f32.mrb[0].mxu0 }
 0x116   : > { %v676_v18 = vmul.f32 0.35355338, %v672_v16  ;;  %v1418_v20 = vpop.f32.mrb[1].mxu0  ;;  %v812_v16 = vand.u32 4294901760, %v811_v10 }
 0x117   : > { %v1427_v20 = vpack.c.bf16 %v818_v13, %v806_v12 }
 0x118   : > { %v678_v21 = vadd.f32 %v677_v17, %v676_v18  ;;  %v824_v17 = vand.u32 4294901760, %v823_v11  ;;  %v834_v18 = vand.u32 4294901760, %v833_v51 }
 0x119   : > { %1428 = vmatprep.subr.bf16.mxu0 %v1427_v20 }
 0x11a   : > { %v683_v23 = vrot.slane %v678_v21, %v682_v19  ;;  %v846_v19 = vand.u32 4294901760, %v845_v52  ;;  %v829_v21 = vsub.f32 %v1740_v49, %v828_v14  ;;  %v858_v49 = vand.u32 4294901760, %v1765_v5 }
 0x11c   : > { %v1709_v24 = vmul.f32 %v683_v23, %v679_v22  ;;  %v841_v22 = vsub.f32 %v839_v50, %v840_v15  ;;  %v1429_v23 = vpack.c.bf16 %v824_v17, %v812_v16  ;;  %v830_v27 = vand.u32 4294901760, %v829_v21 }
 0x11d   : > { %v1457_v36 = vpack.c.bf16 %v846_v19, %v834_v18 }
 0x11e   : > { %v685_v25 = vmul.f32 %v1709_v24, %v1709_v24  ;;  %v842_v28 = vand.u32 4294901760, %v841_v22 }
 0x120   : > { %v687_v26 = vsel %vm686_vm2, %v685_v25, 0.0  ;;  %v835_v25 = vsub.f32 %v833_v51, %v834_v18  ;;  %v1431_v31 = vpack.c.bf16 %v842_v28, %v830_v27  ;;  %v853_v51 = vsub.f32 %v1758_v0, %v852_v47 }
 0x121   : > { %688 = vadd.xlane.f32.xlu0 %v687_v26  ;;  %v847_v26 = vsub.f32 %v845_v52, %v846_v19 }
 0x122   : > { %v836_v29 = vand.u32 4294901760, %v835_v25  ;;  %v854_v52 = vand.u32 4294901760, %v853_v51 }
 0x123   : > { %v848_v30 = vand.u32 4294901760, %v847_v26 }
 0x125   : > { %v1433_v33 = vpack.c.bf16 %v848_v30, %v836_v29 }
 0x1ae   : > { %v689_v37 = vpop.xlane.xlu0 %688 }
 0x1af   : > { %v690_v38 = vmul.f32 0.027777778, %v689_v37 }
 0x1b1   : > { %v691_v39 = vadd.f32 1e-08, %v690_v38 }
 0x1b3   : > { %1529 = vrsqrt.f32 %v691_v39 }
 0x1bd   : > { %v1530_v40 = vpop.eup %1529 }
 0x1be   : > { %v693_v41 = vmul.f32 0.16666667, %v1530_v40 }
 0x1c0   : > { %v694_v42 = vmul.f32 %v693_v41, %v1709_v24  ;;  %v859_v24 = vsub.f32 %v1765_v5, %v858_v49 }
 0x1c2   : > { %v707_v43 = vsel %vm705_vm4, %v694_v42, 0  ;;  %v860_v53 = vand.u32 4294901760, %v859_v24 }
 0x1c3   : > { %v791_v44 = vand.u32 4294901760, %v707_v43 }
 0x1c5   : > { %v792_v45 = vsub.f32 %v707_v43, %v791_v44 }
 0x1c7   : > { %v793_v46 = vand.u32 4294901760, %v792_v45  ;;  %1011 = vmatmul.mubr.f32.vlgmr.msra.gmra.mrb[0].mxu1 %v792_v45 }
 0x1c8   : > { %1446 = vmatpush1.bf16.msra.mxu1 %v1747_v59  ;;  %1091 = vmatprep.mubr.f32.mxu1 %v1595_v1 }
 0x1c9   : > { %1448 = vmatprep.subr.bf16.mxu1 %v1751_v62  ;;  %v794_v48 = vsub.f32 %v792_v45, %v793_v46 }
 0x1cb   : > { %v795_v50 = vand.u32 4294901760, %v794_v48 }
 0x1cc   : > { %1450 = vmatpush1.bf16.msra.mxu1 %v1760_v2 }
 0x1cd   : > { %796 = vmatmul.mubr.f32.vlgmr.msra.gmra.mrb[2].mxu0 %v795_v50  ;;  %1034 = vmatprep.subr.mxu1 %v1749_v60 }
 0x1ce   : > { %1430 = vmatpush1.bf16.msra.mxu0 %v1429_v23  ;;  %916 = vmatprep.mubr.f32.mxu0 %v1595_v1 }
 0x1cf   : > { %1432 = vmatprep.subr.bf16.mxu0 %v1431_v31 }
 0x1d0   : > { %1036 = vmatpush1.msra.mxu1 %v1754_v63 }
 0x1d1   : > { %1095 = vmatmul.mubr.f32.vlgmr.msra.gmra.mrb[0].mxu1 %v793_v46  ;;  %1452 = vmatprep.subr.bf16.mxu1 %v1451_v32 }
 0x1d2   : > { %1434 = vmatpush1.bf16.msra.mxu0 %v1433_v33  ;;  %1454 = vmatpush1.bf16.msra.mxu1 %v1453_v34 }
 0x1d3   : > { %855 = vmatprep.subr.mxu0 %v854_v52  ;;  %1456 = vmatprep.subr.bf16.mxu1 %v1455_v35 }
 0x1d4   : > { %1195 = vmatprep.mubr.f32.mxu1 %v1595_v1 }
 0x1d6   : > { %861 = vmatpush1.msra.mxu0 %v860_v53  ;;  %1458 = vmatpush1.bf16.msra.mxu1 %v1457_v36 }
 0x1d7   : > { %918 = vmatmul.mubr.f32.vlgmr.msra.gmra.mrb[2].mxu0 %v791_v44  ;;  %1136 = vmatprep.subr.mxu1 %v852_v47 }
 0x1da   : > { %1140 = vmatpush1.msra.mxu1 %v858_v49 }
 0x1db   : > { %1197 = vmatmul.mubr.f32.vlgmr.msra.gmra.mrb[0].mxu1 %v791_v44  ;;  %1460 = vmatprep.subr.bf16.mxu1 %v1745_v58 }
 0x1dc   : > { %1462 = vmatpush1.bf16.msra.mxu1 %v1747_v59  ;;  %1277 = vmatprep.mubr.f32.mxu1 %v1595_v1 }
 0x1dd   : > { %1464 = vmatprep.subr.bf16.mxu1 %v1751_v62 }
 0x1e0   : > { %1466 = vmatpush1.bf16.msra.mxu1 %v1760_v2 }
 0x1e1   : > { %1220 = vmatprep.subr.mxu1 %v1749_v60 }
 0x1e4   : > { %1222 = vmatpush1.msra.mxu1 %v1754_v63 }
 0x1e5   : > { %1279 = vmatmul.mubr.f32.vlgmr.msra.gmra.mrb[0].mxu1 %v791_v44 }
 0x2aa   : > { %v919_v54 = vpop.f32.mrb[2].mxu0 }
 0x2ab   : > { %v921_v55 = vpop.f32.mrb[3].mxu0 }
 0x2b8   : > { %v1280_v56 = vpop.f32.mrb[0].mxu1 }
 0x2b9   : > { %v1467_v57 = vadd.f32 %v1280_v56, %v919_v54  ;;  %v1282_v58 = vpop.f32.mrb[1].mxu1 }
 0x2ba   : > { %v1468_v1 = vadd.f32 %v1282_v58, %v921_v55 }
 0x2bc   : > { %v1287_v59 = vcombine.low %v1467_v57, %v1468_v1 }
 0x2be   : > { %1289 = vst [vmem:[%s217_s6] sm:$0xff] %v1287_v59 }
 0x2bf   : > { %1544 = shalt.err (!%p1541_p3)
}
 0x2c0   : > { %s1545_s15 = scalar_lea.hbm %s1807_s10, 128  ;;  %s1549_s23 = scalar_lea.hbm %s1854_s5, 256 }
 0x2c1   : > { %p1546_p4 = scmp.ne.s32.totalorder %s1807_s10, %s1545_s15  ;;  %p1550_p9 = scmp.lt.u32.totalorder %s1807_s10, %s1854_s5 }
 0x2c2   : > { %p1551_p10 = scmp.lt.u32.totalorder %s1549_s23, %s1545_s15  ;;  %p1553_p12 = scmp.lt.u32.totalorder %s1545_s15, %s1807_s10 }
 0x2c3   : > { %p1547_p7 = pnand %p1546_p4, %p1666_p5 }
 0x2c4   : > { %p1552_p11 = por %p1551_p10, %p1550_p9 }
 0x2c5   : > { %p1548_p8 = pneg %p1547_p7 }
 0x2c6   : > { %p1554_p13 = por %p1553_p12, %p1552_p11 }
 0x2c8   : > { %p1555_p0 = pnand %p1554_p13, %p1548_p8 }
 0x2ca   : > { %1558 = shalt.err (!%p1555_p0)
}
 0x2cb   : > { %1488 = dma.vmem_to_hbm [thread:$0]  (%p1666_p5), %s1809_s7, 128, %s1807_s10, %s1291_s11  }
 0x2cc PF: > { %p1494_p1 = scmp.ge.s32.totalorder %s1593_s21, 2  ;;  %s1317_s30 = sand.u32 1, %s1581_s18  }
 0x2cd   : > { %s1318_s6 = scalar_lea.sflag [#allocation3], %s1317_s30 }
 0x2ce   : > { %p1491_p2 = pnand %p1494_p1, %p1670_p6 }
 0x2d0   : > { %1576 = dma.done.wait (!%p1491_p2), %s1318_s6, 128  }
 0x2d1   : > { %1578 = vsyncadd (!%p1491_p2), %s1318_s6, 4294967168  ;;  %p15_p3 = scmp.ge.s32.totalorder %s1653_s24, 4   ;;  %s1857_s18 = smov %s1585_s19 }
 0x2d2   : > { %s1858_s19 = smov %s1589_s20  ;;  %s1859_s20 = smov %s1664_s27 }
 0x2d3   : > { %s1860_s21 = smov %s1653_s24  ;;  %17 = sbr.rel (!%p15_p3) target bundleno = 3 (0x3), region = 76 }
 0x2da   :  { %1323 = vsyncpa [#allocation3], 1 }
 0x2db   :  { %1325 = vsyncpa [#allocation3 + $0x1], 1 }

</bundles_post_ra>
